<compile_context>
chip_gen: v7x
topology: tpu7x:2x2x1
jax: 0.10.0
libtpu: 0.0.40
codegen_flags: <defaults>
</compile_context>

<pallas_src>
import jax
import jax.numpy as jnp
from jax import lax
from jax.experimental import pallas as pl
from jax.experimental.pallas import tpu as pltpu


# ----------------------------- Pallas kernels -------------------------------

def convt_stats_kernel(xt_ref, wt_ref, yt_ref, sum_ref, sq_ref):
    """Fused ConvTranspose2d (as W^T @ X^T matmul) + BN sum / sum-of-squares.

    xt_ref : (K, tl)   3x3-halo patches of the input, positions on lanes
    wt_ref : (R, K)    R = 4*Cout rows = (co, ph, pw)
    yt_ref : (R, tl)   pre-BN activations, lane-dense
    sum_ref, sq_ref : (R, 1) revisited accumulators (reduction over all tiles)
    """
    @pl.when(pl.program_id(0) == 0)
    def _():
        sum_ref[...] = jnp.zeros_like(sum_ref)
        sq_ref[...] = jnp.zeros_like(sq_ref)

    y = jnp.dot(wt_ref[...], xt_ref[...], preferred_element_type=jnp.float32)
    yt_ref[...] = y
    # Cross-lane reduce -> XLU slot (cheap next to the matmul / stores).
    sum_ref[...] += jnp.sum(y, axis=1, keepdims=True)
    sq_ref[...] += jnp.sum(y * y, axis=1, keepdims=True)


def scale_shift_relu_kernel(yt_ref, scale_ref, shift_ref, o_ref):
    """Folded BatchNorm (y*scale + shift) + ReLU, lane-dense elementwise pass."""
    o_ref[...] = jnp.maximum(yt_ref[...] * scale_ref[...] + shift_ref[...], 0.0)


# ------------------------------ wrapper --------------------------------------

def _round_up(a, b):
    return ((a + b - 1) // b) * b


def upsample_block_forward(x, w_ct, b_ct, gamma, beta, *, eps=1e-5, tl_max=1024):
    """ConvTranspose2d(k=4,s=2,p=1) -> BatchNorm2d (train) -> ReLU.

    x     : (N, Cin, H, W)        float32, NCHW
    w_ct  : (Cin, Cout, 4, 4)     ConvTranspose2d weight (PyTorch layout)
    b_ct  : (Cout,)               ConvTranspose2d bias (unused: cancelled by BN)
    gamma : (Cout,)  beta : (Cout,)   BatchNorm affine params
    returns (N, Cout, 2H, 2W)
    """
    del b_ct  # exactly cancelled by training-mode BatchNorm (batch_norm=True path)

    N, Cin, H, W = x.shape
    Cout = w_ct.shape[1]
    OH, OW = 2 * H, 2 * W
    M = N * H * W                 # output "super-pixels"; each yields 2x2 outputs
    K = 9 * Cin                   # 3x3 halo of the original input
    R = 4 * Cout                  # rows = (co, ph, pw)

    # --- glue: X^T patches.  Column = (n, m, n'), row = (dh*3+dw)*Cin + ci,
    #     value = x[n, ci, m+dh-1, n'+dw-1] (zero outside).  Channel-major input
    #     layout (CNHW) makes this a stack of 9 shifted slices, no big transpose.
    xc = x.transpose(1, 0, 2, 3)                                  # (Cin, N, H, W)
    xc_pad = jnp.pad(xc, ((0, 0), (0, 0), (1, 1), (1, 1)))
    taps = [xc_pad[:, :, dh:dh + H, dw:dw + W]
            for dh in range(3) for dw in range(3)]                # 9 x (Cin,N,H,W)
    Xt = jnp.stack(taps, axis=0).reshape(K, M)

    # --- glue: W^T with the sub-pixel (pixel-shuffle) tap selection.
    #     kh used by output parity ph at halo offset dh (−1 = unused):
    kh_of = ((3, 1, -1),       # ph = 0 (even output rows)
             (-1, 2, 0))       # ph = 1 (odd output rows)
    Wt = jnp.zeros((R, K), jnp.float32)
    for ph in range(2):
        for pw in range(2):
            p = ph * 2 + pw
            for dh in range(3):
                kh = kh_of[ph][dh]
                if kh < 0:
                    continue
                for dw in range(3):
                    kw = kh_of[pw][dw]
                    if kw < 0:
                        continue
                    t = dh * 3 + dw
                    Wt = Wt.at[p::4, t * Cin:(t + 1) * Cin].set(
                        w_ct[:, :, kh, kw].T)

    # --- tiling over M (lanes). Pad M to a multiple of the lane tile; padded
    #     columns are zero -> zero y columns (no bias), so stats just use the
    #     true element count.
    tl = min(tl_max, _round_up(M, 128))
    Mp = _round_up(M, tl)
    if Mp != M:
        Xt = jnp.pad(Xt, ((0, 0), (0, Mp - M)))
    grid = (Mp // tl,)

    # --- Pallas pass 1: ConvTranspose2d matmul + fused BN statistics.
    yt, sums, sqs = pl.pallas_call(
        convt_stats_kernel,
        out_shape=(jax.ShapeDtypeStruct((R, Mp), jnp.float32),
                   jax.ShapeDtypeStruct((R, 1), jnp.float32),
                   jax.ShapeDtypeStruct((R, 1), jnp.float32)),
        grid_spec=pltpu.PrefetchScalarGridSpec(
            num_scalar_prefetch=0, grid=grid,
            in_specs=[pl.BlockSpec((K, tl), lambda j: (0, j)),
                      pl.BlockSpec((R, K), lambda j: (0, 0))],
            out_specs=[pl.BlockSpec((R, tl), lambda j: (0, j)),
                       pl.BlockSpec((R, 1), lambda j: (0, 0)),
                       pl.BlockSpec((R, 1), lambda j: (0, 0))]),
        compiler_params=pltpu.CompilerParams(
            # Must stay "arbitrary": the (R,1) accumulators are revisited
            # across this axis (see v7x note in the header).
            dimension_semantics=("arbitrary",)),
    )(Xt, Wt)

    # --- fold BN into per-row scale/shift (8 channels -> 32 rows, trivial).
    count = jnp.float32(4 * M)                         # = N*OH*OW per channel
    ch_sum = sums.reshape(Cout, 4).sum(axis=1)
    ch_sq = sqs.reshape(Cout, 4).sum(axis=1)
    mean = ch_sum / count
    var = ch_sq / count - mean * mean                  # biased var (PyTorch train)
    scale = gamma * lax.rsqrt(var + eps)
    shift = beta - mean * scale
    scale_r = jnp.repeat(scale, 4).reshape(R, 1)
    shift_r = jnp.repeat(shift, 4).reshape(R, 1)

    # --- Pallas pass 2: normalize + ReLU (lane-dense elementwise).
    out_t = pl.pallas_call(
        scale_shift_relu_kernel,
        out_shape=jax.ShapeDtypeStruct((R, Mp), jnp.float32),
        grid_spec=pltpu.PrefetchScalarGridSpec(
            num_scalar_prefetch=0, grid=grid,
            in_specs=[pl.BlockSpec((R, tl), lambda j: (0, j)),
                      pl.BlockSpec((R, 1), lambda j: (0, 0)),
                      pl.BlockSpec((R, 1), lambda j: (0, 0))],
            out_specs=pl.BlockSpec((R, tl), lambda j: (0, j))),
        compiler_params=pltpu.CompilerParams(
            dimension_semantics=("parallel",)),
    )(yt, scale_r, shift_r)

    # --- glue: assemble NCHW.  Rows are (co, ph, pw), columns are (n, m, n').
    out = out_t[:, :M].reshape(Cout, 2, 2, N, H, W)
    out = out.transpose(3, 0, 4, 1, 5, 2).reshape(N, Cout, OH, OW)
    return out


# ------------------------------ reference ------------------------------------

def reference_forward(x, w_ct, b_ct, gamma, beta, eps=1e-5):
    rhs = jnp.flip(w_ct, axis=(2, 3)).transpose(1, 0, 2, 3)   # (Cout, Cin, 4, 4)
    y = lax.conv_general_dilated(
        x, rhs, window_strides=(1, 1), padding=((2, 2), (2, 2)),
        lhs_dilation=(2, 2), dimension_numbers=("NCHW", "OIHW", "NCHW"))
    y = y + b_ct.reshape(1, -1, 1, 1)
    mean = y.mean(axis=(0, 2, 3), keepdims=True)
    var = y.var(axis=(0, 2, 3), keepdims=True)
    yhat = ((y - mean) / jnp.sqrt(var + eps)
            * gamma.reshape(1, -1, 1, 1) + beta.reshape(1, -1, 1, 1))
    return jnp.maximum(yhat, 0.0)


# -------------------------------- main ----------------------------------------

if __name__ == "__main__":
    N, Cin, H, W = 2, 4, 16, 16
    Cout = 8

    key = jax.random.PRNGKey(0)
    kx, kw, kb, kg, kbeta = jax.random.split(key, 5)

    x = jax.random.normal(kx, (N, Cin, H, W), dtype=jnp.float32)
    w_ct = 0.1 * jax.random.normal(kw, (Cin, Cout, 4, 4), dtype=jnp.float32)
    b_ct = 0.1 * jax.random.normal(kb, (Cout,), dtype=jnp.float32)
    gamma = 1.0 + 0.1 * jax.random.normal(kg, (Cout,), dtype=jnp.float32)
    beta = 0.1 * jax.random.normal(kbeta, (Cout,), dtype=jnp.float32)

    out = upsample_block_forward(x, w_ct, b_ct, gamma, beta)
    out = jax.block_until_ready(out)

    ref = reference_forward(x, w_ct, b_ct, gamma, beta)
    assert out.shape == (N, Cout, 2 * H, 2 * W), out.shape
    assert jnp.allclose(out, ref, atol=2e-2, rtol=2e-2), (
        float(jnp.max(jnp.abs(out - ref))))

    print("KERNEL_OK")
</pallas_src>

<mosaic_0001>
module attributes {stable_mosaic.version = 11 : i64} {
  func.func @convt_stats_kernel(%arg0: i32, %arg1: memref<36x512xf32, #tpu.memory_space<vmem>>, %arg2: memref<32x36xf32, #tpu.memory_space<vmem>>, %arg3: memref<32x512xf32, #tpu.memory_space<vmem>>, %arg4: memref<32x1xf32, #tpu.memory_space<vmem>>, %arg5: memref<32x1xf32, #tpu.memory_space<vmem>>) attributes {dimension_semantics = [#tpu.dimension_semantics<arbitrary>], iteration_bounds = array<i64: 1>, scalar_prefetch = 0 : i64, scratch_operands = 0 : i64, tpu.core_type = #tpu.core_type<tc>, window_params = [{transform_indices = @transform_0, window_bounds = array<i64: 36, 512>}, {pipeline_mode = #tpu.pipeline_mode<synchronous>, transform_indices = @transform_1, window_bounds = array<i64: 32, 36>}, {transform_indices = @transform_2, window_bounds = array<i64: 32, 512>}, {pipeline_mode = #tpu.pipeline_mode<synchronous>, transform_indices = @transform_3, window_bounds = array<i64: 32, 1>}, {pipeline_mode = #tpu.pipeline_mode<synchronous>, transform_indices = @transform_4, window_bounds = array<i64: 32, 1>}]} {
    %c0_i32 = arith.constant 0 : i32
    %0 = arith.cmpi eq, %arg0, %c0_i32 : i32
    %1 = arith.extui %0 : i1 to i32
    %c0_i32_0 = arith.constant 0 : i32
    %2 = arith.cmpi ne, %1, %c0_i32_0 : i32
    scf.if %2 {
      %cst_16 = arith.constant 0.000000e+00 : f32
      %18 = vector.broadcast %cst_16 : f32 to vector<32x1xf32>
      %c0_17 = arith.constant 0 : index
      %c0_18 = arith.constant 0 : index
      %19 = vector.load %arg4[%c0_17, %c0_18] : memref<32x1xf32, #tpu.memory_space<vmem>>, vector<32x1xf32>
      tpu.vector_store %arg4[%c0_17, %c0_18], %18 {strides = array<i32>} : memref<32x1xf32, #tpu.memory_space<vmem>>, vector<32x1xf32>,
      %cst_19 = arith.constant 0.000000e+00 : f32
      %20 = vector.broadcast %cst_19 : f32 to vector<32x1xf32>
      %c0_20 = arith.constant 0 : index
      %c0_21 = arith.constant 0 : index
      %21 = vector.load %arg5[%c0_20, %c0_21] : memref<32x1xf32, #tpu.memory_space<vmem>>, vector<32x1xf32>
      tpu.vector_store %arg5[%c0_20, %c0_21], %20 {strides = array<i32>} : memref<32x1xf32, #tpu.memory_space<vmem>>, vector<32x1xf32>,
    } else {
    }
    %c0 = arith.constant 0 : index
    %c0_1 = arith.constant 0 : index
    %3 = vector.load %arg2[%c0, %c0_1] : memref<32x36xf32, #tpu.memory_space<vmem>>, vector<32x36xf32>
    %c0_2 = arith.constant 0 : index
    %c0_3 = arith.constant 0 : index
    %4 = vector.load %arg1[%c0_2, %c0_3] : memref<36x512xf32, #tpu.memory_space<vmem>>, vector<36x512xf32>
    %cst = arith.constant dense<0.000000e+00> : vector<32x512xf32>
    %5 = tpu.matmul %3, %4, %cst {dimension_numbers = #tpu.dot_dimension_numbers<[1], [0], [0], [1], [0, 0, 1, 1], [], []>} : vector<32x36xf32>, vector<36x512xf32>, vector<32x512xf32> -> vector<32x512xf32>
    %c0_4 = arith.constant 0 : index
    %c0_5 = arith.constant 0 : index
    %6 = vector.load %arg3[%c0_4, %c0_5] : memref<32x512xf32, #tpu.memory_space<vmem>>, vector<32x512xf32>
    tpu.vector_store %arg3[%c0_4, %c0_5], %5 {strides = array<i32>} : memref<32x512xf32, #tpu.memory_space<vmem>>, vector<32x512xf32>,
    %c0_6 = arith.constant 0 : index
    %c0_7 = arith.constant 0 : index
    %7 = vector.load %arg4[%c0_6, %c0_7] : memref<32x1xf32, #tpu.memory_space<vmem>>, vector<32x1xf32>
    %cst_8 = arith.constant dense<0.000000e+00> : vector<32xf32>
    %8 = vector.multi_reduction <add>, %5, %cst_8 [1] : vector<32x512xf32> to vector<32xf32>
    %9 = vector.shape_cast %8 : vector<32xf32> to vector<32x1xf32>
    %10 = arith.addf %7, %9 : vector<32x1xf32>
    %c0_9 = arith.constant 0 : index
    %c0_10 = arith.constant 0 : index
    %11 = vector.load %arg4[%c0_9, %c0_10] : memref<32x1xf32, #tpu.memory_space<vmem>>, vector<32x1xf32>
    tpu.vector_store %arg4[%c0_9, %c0_10], %10 {strides = array<i32>} : memref<32x1xf32, #tpu.memory_space<vmem>>, vector<32x1xf32>,
    %c0_11 = arith.constant 0 : index
    %c0_12 = arith.constant 0 : index
    %12 = vector.load %arg5[%c0_11, %c0_12] : memref<32x1xf32, #tpu.memory_space<vmem>>, vector<32x1xf32>
    %13 = arith.mulf %5, %5 : vector<32x512xf32>
    %cst_13 = arith.constant dense<0.000000e+00> : vector<32xf32>
    %14 = vector.multi_reduction <add>, %13, %cst_13 [1] : vector<32x512xf32> to vector<32xf32>
    %15 = vector.shape_cast %14 : vector<32xf32> to vector<32x1xf32>
    %16 = arith.addf %12, %15 : vector<32x1xf32>
    %c0_14 = arith.constant 0 : index
    %c0_15 = arith.constant 0 : index
    %17 = vector.load %arg5[%c0_14, %c0_15] : memref<32x1xf32, #tpu.memory_space<vmem>>, vector<32x1xf32>
    tpu.vector_store %arg5[%c0_14, %c0_15], %16 {strides = array<i32>} : memref<32x1xf32, #tpu.memory_space<vmem>>, vector<32x1xf32>,
    return
  }
  func.func @transform_0(%arg0: i32) -> (i32, i32) {
    %c0_i32 = arith.constant 0 : i32
    %c0_i32_0 = arith.constant 0 : i32
    return %c0_i32, %arg0 : i32, i32
  }
  func.func @transform_1(%arg0: i32) -> (i32, i32) {
    %c0_i32 = arith.constant 0 : i32
    %c0_i32_0 = arith.constant 0 : i32
    %c0_i32_1 = arith.constant 0 : i32
    return %c0_i32, %c0_i32_0 : i32, i32
  }
  func.func @transform_2(%arg0: i32) -> (i32, i32) {
    %c0_i32 = arith.constant 0 : i32
    %c0_i32_0 = arith.constant 0 : i32
    return %c0_i32, %arg0 : i32, i32
  }
  func.func @transform_3(%arg0: i32) -> (i32, i32) {
    %c0_i32 = arith.constant 0 : i32
    %c0_i32_0 = arith.constant 0 : i32
    %c0_i32_1 = arith.constant 0 : i32
    return %c0_i32, %c0_i32_0 : i32, i32
  }
  func.func @transform_4(%arg0: i32) -> (i32, i32) {
    %c0_i32 = arith.constant 0 : i32
    %c0_i32_0 = arith.constant 0 : i32
    %c0_i32_1 = arith.constant 0 : i32
    return %c0_i32, %c0_i32_0 : i32, i32
  }
}

</mosaic_0001>

<bundles_post_ra>
// kernel: tpu_custom_call.1
= control target key start
LH: loop header
LB: loop body
LE: loop exit
PB: predicated region body
PF: predicated region fallthrough
CT: control target
= control target key end

     0   :  { %10 = vsyncpa [#allocation3], 0  ;;  %s702_s0 = inlined_call_operand.hbm [shape: f32[36,512], index: 0, kind: input, shape index: {}]   ;;  %s703_s1 = inlined_call_operand.hbm [shape: f32[32,36], index: 1, kind: input, shape index: {}]   ;;  %s704_s2 = inlined_call_operand.hbm [shape: f32[32,512], index: 2, kind: output, shape index: {0}]   ;;  %s705_s3 = inlined_call_operand.vmem [shape: f32[32,1], index: 3, kind: output, shape index: {1}]   ;;  %s706_s4 = inlined_call_operand.vmem [shape: f32[32,1], index: 4, kind: output, shape index: {2}]  }
   0x1   :  { %11 = vsyncpa [#allocation6], 0 }
   0x2   :  { %12 = vsyncpa [#allocation4], 0  ;;  %s515_s15 = smov [#allocation2]   ;;  %s443_s19 = scalar_lea.hbm %s702_s0, 2560 }
   0x3   :  { %s18_s16 = sshll.u32 %s515_s15, 4  ;;  %p444_p0 = scmp.ne.s32.totalorder %s702_s0, %s443_s19  ;;  %s19_s16 = int_to_ptr.vmem [resolvable:$true] %s18_s16 }
   0x4   :  { %p447_p1 = scmp.lt.u32.totalorder %s443_s19, %s702_s0 }
   0x6   :  { %p449_p2 = pnand %p447_p1, %p444_p0 }
   0x8   :  { %452 = shalt.err (!%p449_p2)
}
   0x9   :  { %s453_s24 = scalar_lea.vmem %s19_s16, 2560  ;;  %p458_p4 = scmp.lt.s32.totalorder %s19_s16, %s19_s16 }
   0xa   :  { %p454_p3 = scmp.ne.s32.totalorder %s19_s16, %s453_s24  ;;  %p459_p5 = scmp.lt.s32.totalorder %s453_s24, %s453_s24 }
   0xc   :  { %p460_p6 = por %p459_p5, %p458_p4 }
   0xe   :  { %p461_p7 = pnand %p460_p6, %p454_p3 }
  0x10   :  { %464 = shalt.err (!%p461_p7)
}
  0x11   :  { %s516_s25 = smov 512   ;;  %s517_s26 = smov 32  }
  0x12   :  { %24 = dma.hbm_to_vmem [thread:$0]  %s702_s0, 2560, %s19_s16, [#allocation3], %s516_s25, %s516_s25, %s517_s26  }
  0x13   :  { %s518_s29 = smov [#allocation5]   ;;  %s465_s7 = scalar_lea.hbm %s703_s1, 512 }
  0x14   :  { %s30_s30 = sshll.u32 %s518_s29, 4  ;;  %p466_p8 = scmp.ne.s32.totalorder %s703_s1, %s465_s7  ;;  %s31_s30 = int_to_ptr.vmem [resolvable:$true] %s30_s30 }
  0x15   :  { %p469_p9 = scmp.lt.u32.totalorder %s465_s7, %s703_s1 }
  0x17   :  { %p471_p10 = pnand %p469_p9, %p466_p8 }
  0x19   :  { %474 = shalt.err (!%p471_p10)
}
  0x1a   :  { %s475_s12 = scalar_lea.vmem %s31_s30, 512  ;;  %p480_p12 = scmp.lt.s32.totalorder %s31_s30, %s31_s30 }
  0x1b   :  { %p476_p11 = scmp.ne.s32.totalorder %s31_s30, %s475_s12  ;;  %p481_p13 = scmp.lt.s32.totalorder %s475_s12, %s475_s12 }
  0x1d   :  { %p482_p0 = por %p481_p13, %p480_p12 }
  0x1f   :  { %p483_p1 = pnand %p482_p0, %p476_p11 }
  0x21   :  { %486 = shalt.err (!%p483_p1)
}
  0x22   :  { %s519_s0 = smov 128   ;;  %s520_s13 = smov 8  }
  0x23   :  { %36 = dma.hbm_to_vmem [thread:$0]  %s703_s1, 512, %s31_s30, [#allocation6], %s519_s0, %s519_s0, %s520_s13  }
  0x24   :  { %509 = dma.done.wait [#allocation3], 2560  }
  0x25   :  { %510 = vsyncadd [#allocation3], 4294964736 }
  0x26   :  { %511 = dma.done.wait [#allocation6], 512  }
  0x27   :  { %512 = vsyncadd [#allocation6], 4294966784  ;;  %v521_v0 = vmov 0.0   ;;  %v61_v1 = vld [vmem:[#allocation2 + $0x8] sm:$0xff]  ;;  %v60_v3 = vld [vmem:[#allocation2] sm:$0xff]  ;;  %vm93_vm0 = vcmask 1043456  }
  0x28   :  { %170 = vmatprep.mubr.f32.mxu0 %v521_v0  ;;  %259 = vmatprep.mubr.f32.mxu1 %v521_v0  ;;  %v65_v2 = vld [vmem:[#allocation2 + $0x28] sm:$0xff]  ;;  %v64_v5 = vld [vmem:[#allocation2 + $0x20] sm:$0xff]  ;;  %v63_v6 = vld [vmem:[#allocation2 + $0x18] sm:$0xff]  ;;  %vm80_vm1 = vcmask 293888   ;;  %vm47_vm2 = vcmask 7168   ;;  %s522_s7 = smov [#allocation7]  }
  0x29   :  { %v419_v4 = vpack.c.bf16 %v65_v2, %v61_v1  ;;  %v67_v7 = vld [vmem:[#allocation2 + $0x38] sm:$0xff]  ;;  %v421_v8 = vpack.c.bf16 %v64_v5, %v60_v3  ;;  %v62_v10 = vld [vmem:[#allocation2 + $0x10] sm:$0xff]  ;;  %v69_v12 = vld [vmem:[#allocation2 + $0x48] sm:$0xff]  ;;  %48 = vst.msk [vmem:[%s705_s3] sm:$0xff] %vm47_vm2, %v521_v0  ;;  %s386_s8 = sshll.u32 %s522_s7, 4  ;;  %s387_s8 = int_to_ptr.vmem [resolvable:$true] %s386_s8 }
  0x2a   :  { %v427_v9 = vpack.c.bf16 %v67_v7, %v63_v6  ;;  %v66_v11 = vld [vmem:[#allocation2 + $0x30] sm:$0xff]  ;;  %v73_v14 = vld [vmem:[#allocation2 + $0x68] sm:$0xff]  ;;  %v68_v15 = vld [vmem:[#allocation2 + $0x40] sm:$0xff]  ;;  %49 = vst.msk [vmem:[%s705_s3 + $0x8] sm:$0xff] %vm47_vm2, %v521_v0  ;;  %s487_s9 = scalar_lea.vmem %s387_s8, 2048  ;;  %p492_p3 = scmp.lt.s32.totalorder %s387_s8, %s387_s8 }
  0x2b   :  { %420 = vmatprep.subr.bf16.mxu0 %v419_v4  ;;  %v429_v13 = vpack.c.bf16 %v66_v11, %v62_v10  ;;  %v72_v16 = vld [vmem:[#allocation2 + $0x60] sm:$0xff]  ;;  %v423_v17 = vpack.c.bf16 %v73_v14, %v69_v12  ;;  %v71_v19 = vld [vmem:[#allocation2 + $0x58] sm:$0xff]  ;;  %v70_v21 = vld [vmem:[#allocation2 + $0x50] sm:$0xff]  ;;  %50 = vst.msk [vmem:[%s705_s3 + $0x10] sm:$0xff] %vm47_vm2, %v521_v0  ;;  %p488_p2 = scmp.ne.s32.totalorder %s387_s8, %s487_s9  ;;  %p493_p4 = scmp.lt.s32.totalorder %s487_s9, %s487_s9 }
  0x2c   :  { %422 = vmatpush1.bf16.msra.mxu0 %v421_v8  ;;  %428 = vmatprep.subr.bf16.mxu1 %v427_v9  ;;  %v425_v18 = vpack.c.bf16 %v72_v16, %v68_v15  ;;  %v75_v20 = vld [vmem:[#allocation2 + $0x78] sm:$0xff]  ;;  %v74_v23 = vld [vmem:[#allocation2 + $0x70] sm:$0xff]  ;;  %v77_v25 = vld [vmem:[#allocation2 + $0x88] sm:$0xf]  ;;  %51 = vst.msk [vmem:[%s705_s3 + $0x18] sm:$0xff] %vm47_vm2, %v521_v0 }
  0x2d   :  { %430 = vmatpush1.bf16.msra.mxu1 %v429_v13  ;;  %v431_v22 = vpack.c.bf16 %v75_v20, %v71_v19  ;;  %424 = vmatprep.subr.bf16.mxu0 %v423_v17  ;;  %v433_v24 = vpack.c.bf16 %v74_v23, %v70_v21  ;;  %v79_v26 = vld [vmem:[#allocation2 + $0x98] sm:$0xf]  ;;  %v76_v27 = vld [vmem:[#allocation2 + $0x80] sm:$0xf]  ;;  %v78_v29 = vld [vmem:[#allocation2 + $0x90] sm:$0xf]  ;;  %p494_p5 = por %p493_p4, %p492_p3 }
  0x2e   :  { %v56_v28 = vld [vmem:[#allocation5] sm:$0xff]  ;;  %v57_v30 = vld [vmem:[#allocation5 + $0x8] sm:$0xff]  ;;  %v58_v31 = vld [vmem:[#allocation5 + $0x10] sm:$0xff]  ;;  %52 = vst.msk [vmem:[%s706_s4] sm:$0xff] %vm47_vm2, %v521_v0 }
  0x2f   :  { %432 = vmatprep.subr.bf16.mxu1 %v431_v22  ;;  %v59_v32 = vld [vmem:[#allocation5 + $0x18] sm:$0xff]  ;;  %53 = vst.msk [vmem:[%s706_s4 + $0x8] sm:$0xff] %vm47_vm2, %v521_v0  ;;  %54 = vst.msk [vmem:[%s706_s4 + $0x10] sm:$0xff] %vm47_vm2, %v521_v0  ;;  %p495_p6 = pnand %p494_p5, %p488_p2 }
  0x30   :  { %426 = vmatpush1.bf16.msra.mxu0 %v425_v18  ;;  %55 = vst.msk [vmem:[%s706_s4 + $0x18] sm:$0xff] %vm47_vm2, %v521_v0 }
  0x31   :  { %434 = vmatpush1.bf16.msra.mxu1 %v433_v24  ;;  %407 = vmatprep.subr.msk.mxu0 %vm93_vm0, %v77_v25 }
  0x32   :  { %413 = vmatprep.subr.msk.mxu1 %vm93_vm0, %v79_v26 }
  0x34   :  { %408 = vmatpush1.msk.msra.mxu0 %vm93_vm0, %v76_v27 }
  0x35   :  { %409 = vmatmul.mubr.msk.f32.vlgmr.msra.gmra.mrb[0].mxu0 %vm80_vm1, %v56_v28  ;;  %414 = vmatpush1.msk.msra.mxu1 %vm93_vm0, %v78_v29 }
  0x36   :  { %415 = vmatmul.mubr.msk.f32.vlgmr.msra.gmra.mrb[0].mxu1 %vm80_vm1, %v56_v28  ;;  %176 = vmatprep.mubr.f32.mxu0 %v521_v0 }
  0x37   :  { %265 = vmatprep.mubr.f32.mxu1 %v521_v0 }
  0x39   :  { %410 = vmatmul.mubr.msk.f32.gmra.mrb[2].mxu0 %vm80_vm1, %v57_v30 }
  0x3a   :  { %416 = vmatmul.mubr.msk.f32.gmra.mrb[2].mxu1 %vm80_vm1, %v57_v30  ;;  %182 = vmatprep.mubr.f32.mxu0 %v521_v0 }
  0x3b   :  { %271 = vmatprep.mubr.f32.mxu1 %v521_v0 }
  0x3d   :  { %411 = vmatmul.mubr.msk.f32.gmra.mrb[4].mxu0 %vm80_vm1, %v58_v31 }
  0x3e   :  { %188 = vmatprep.mubr.f32.mxu0 %v521_v0  ;;  %417 = vmatmul.mubr.msk.f32.gmra.mrb[4].mxu1 %vm80_vm1, %v58_v31 }
  0x3f   :  { %277 = vmatprep.mubr.f32.mxu1 %v521_v0 }
  0x41   :  { %412 = vmatmul.mubr.msk.f32.gmra.mrb[6].mxu0 %vm80_vm1, %v59_v32 }
  0x42   :  { %418 = vmatmul.mubr.msk.f32.gmra.mrb[6].mxu1 %vm80_vm1, %v59_v32 }
 0x108   :  { %v172_v33 = vpop.f32.mrb[0].mxu0 }
 0x109   :  { %284 = vst [vmem:[#allocation7] sm:$0xff] %v172_v33  ;;  %v337_v34 = vmul.f32 %v172_v33, %v172_v33  ;;  %v174_v35 = vpop.f32.mrb[1].mxu0  ;;  %v261_v36 = vpop.f32.mrb[0].mxu1 }
 0x10a   :  { %285 = vst [vmem:[#allocation7 + $0x8] sm:$0xff] %v174_v35  ;;  %v304_v37 = vadd.f32 %v174_v35, %v172_v33  ;;  %v338_v38 = vmul.f32 %v174_v35, %v174_v35  ;;  %286 = vst [vmem:[#allocation7 + $0x10] sm:$0xff] %v261_v36  ;;  %v263_v39 = vpop.f32.mrb[1].mxu1  ;;  %v339_v40 = vmul.f32 %v261_v36, %v261_v36 }
 0x10b   :  { %287 = vst [vmem:[#allocation7 + $0x18] sm:$0xff] %v263_v39  ;;  %v340_v52 = vmul.f32 %v263_v39, %v263_v39 }
 0x10c   :  { %v178_v41 = vpop.f32.mrb[2].mxu0  ;;  %v305_v42 = vadd.f32 %v304_v37, %v261_v36  ;;  %v353_v43 = vadd.f32 %v338_v38, %v337_v34 }
 0x10d   :  { %288 = vst [vmem:[#allocation7 + $0x20] sm:$0xff] %v178_v41  ;;  %v341_v44 = vmul.f32 %v178_v41, %v178_v41  ;;  %v180_v45 = vpop.f32.mrb[3].mxu0  ;;  %v267_v46 = vpop.f32.mrb[2].mxu1 }
 0x10e   :  { %289 = vst [vmem:[#allocation7 + $0x28] sm:$0xff] %v180_v45  ;;  %v309_v47 = vadd.f32 %v180_v45, %v178_v41  ;;  %v342_v48 = vmul.f32 %v180_v45, %v180_v45  ;;  %290 = vst [vmem:[#allocation7 + $0x30] sm:$0xff] %v267_v46  ;;  %v343_v49 = vmul.f32 %v267_v46, %v267_v46  ;;  %v269_v50 = vpop.f32.mrb[3].mxu1 }
 0x10f   :  { %v306_v51 = vadd.f32 %v305_v42, %v263_v39  ;;  %291 = vst [vmem:[#allocation7 + $0x38] sm:$0xff] %v269_v50  ;;  %v354_v53 = vadd.f32 %v353_v43, %v339_v40  ;;  %v344_v0 = vmul.f32 %v269_v50, %v269_v50 }
 0x110   :  { %v184_v54 = vpop.f32.mrb[4].mxu0  ;;  %v358_v55 = vadd.f32 %v342_v48, %v341_v44  ;;  %v310_v56 = vadd.f32 %v309_v47, %v267_v46 }
 0x111   :  { %307 = vadd.xlane.f32.xlu0 %v306_v51  ;;  %292 = vst [vmem:[#allocation7 + $0x40] sm:$0xff] %v184_v54  ;;  %v345_v57 = vmul.f32 %v184_v54, %v184_v54  ;;  %v186_v58 = vpop.f32.mrb[5].mxu0  ;;  %v273_v59 = vpop.f32.mrb[4].mxu1  ;;  %v355_v60 = vadd.f32 %v354_v53, %v340_v52 }
 0x112   :  { %293 = vst [vmem:[#allocation7 + $0x48] sm:$0xff] %v186_v58  ;;  %v314_v61 = vadd.f32 %v186_v58, %v184_v54  ;;  %v346_v62 = vmul.f32 %v186_v58, %v186_v58  ;;  %294 = vst [vmem:[#allocation7 + $0x50] sm:$0xff] %v273_v59  ;;  %v275_v63 = vpop.f32.mrb[5].mxu1  ;;  %v359_v1 = vadd.f32 %v358_v55, %v343_v49 }
 0x113   :  { %v347_v2 = vmul.f32 %v273_v59, %v273_v59  ;;  %295 = vst [vmem:[#allocation7 + $0x58] sm:$0xff] %v275_v63  ;;  %v311_v3 = vadd.f32 %v310_v56, %v269_v50  ;;  %v348_v11 = vmul.f32 %v275_v63, %v275_v63 }
 0x114   :  { %v190_v4 = vpop.f32.mrb[6].mxu0  ;;  %v360_v5 = vadd.f32 %v359_v1, %v344_v0  ;;  %v315_v6 = vadd.f32 %v314_v61, %v273_v59  ;;  %v363_v7 = vadd.f32 %v346_v62, %v345_v57 }
 0x115   :  { %356 = vadd.xlane.f32.xlu0 %v355_v60  ;;  %296 = vst [vmem:[#allocation7 + $0x60] sm:$0xff] %v190_v4  ;;  %v349_v8 = vmul.f32 %v190_v4, %v190_v4  ;;  %v192_v9 = vpop.f32.mrb[7].mxu0  ;;  %v279_v10 = vpop.f32.mrb[6].mxu1 }
 0x116   :  { %297 = vst [vmem:[#allocation7 + $0x68] sm:$0xff] %v192_v9  ;;  %v319_v12 = vadd.f32 %v192_v9, %v190_v4  ;;  %v350_v13 = vmul.f32 %v192_v9, %v192_v9  ;;  %361 = vadd.xlane.f32.xlu1 %v360_v5  ;;  %298 = vst [vmem:[#allocation7 + $0x70] sm:$0xff] %v279_v10  ;;  %v351_v14 = vmul.f32 %v279_v10, %v279_v10  ;;  %v281_v15 = vpop.f32.mrb[7].mxu1 }
 0x117   :  { %v316_v16 = vadd.f32 %v315_v6, %v275_v63  ;;  %299 = vst [vmem:[#allocation7 + $0x78] sm:$0xff] %v281_v15  ;;  %v364_v17 = vadd.f32 %v363_v7, %v347_v2  ;;  %v352_v19 = vmul.f32 %v281_v15, %v281_v15 }
 0x118   :  { %v368_v18 = vadd.f32 %v350_v13, %v349_v8  ;;  %v320_v20 = vadd.f32 %v319_v12, %v279_v10 }
 0x119   :  { %312 = vadd.xlane.f32.xlu0 %v311_v3  ;;  %v365_v21 = vadd.f32 %v364_v17, %v348_v11 }
 0x11a   :  { %317 = vadd.xlane.f32.xlu1 %v316_v16  ;;  %v321_v22 = vadd.f32 %v320_v20, %v281_v15  ;;  %v369_v23 = vadd.f32 %v368_v18, %v351_v14 }
 0x11c   :  { %v370_v24 = vadd.f32 %v369_v23, %v352_v19 }
 0x11d   :  { %366 = vadd.xlane.f32.xlu0 %v365_v21 }
 0x11e   :  { %322 = vadd.xlane.f32.xlu1 %v321_v22 }
 0x122   :  { %371 = vadd.xlane.f32.xlu1 %v370_v24 }
 0x123   :  { %498 = shalt.err (!%p495_p6)
}
 0x124   :  { %s499_s12 = scalar_lea.hbm %s704_s2, 2048 }
 0x125   :  { %p500_p7 = scmp.ne.s32.totalorder %s704_s2, %s499_s12  ;;  %p503_p8 = scmp.lt.u32.totalorder %s499_s12, %s704_s2 }
 0x127   :  { %p505_p9 = pnand %p503_p8, %p500_p7 }
 0x129   :  { %508 = shalt.err (!%p505_p9)
}
 0x12a   :  { %392 = dma.vmem_to_hbm [thread:$0]  %s387_s8, 2048, %s704_s2, [#allocation4], %s516_s25, %s516_s25, %s517_s26  }
 0x12b   :  { %v300_v25 = vld [vmem:[%s705_s3] sm:$0xff]  ;;  %v334_v30 = vld [vmem:[%s706_s4 + $0x8] sm:$0xff]  ;;  %v302_v36 = vld [vmem:[%s705_s3 + $0x10] sm:$0xff] }
 0x12c   :  { %v333_v28 = vld [vmem:[%s706_s4] sm:$0xff]  ;;  %v301_v33 = vld [vmem:[%s705_s3 + $0x8] sm:$0xff]  ;;  %v335_v39 = vld [vmem:[%s706_s4 + $0x10] sm:$0xff] }
 0x12d   :  { %v303_v42 = vld [vmem:[%s705_s3 + $0x18] sm:$0xff] }
 0x12e   :  { %v336_v46 = vld [vmem:[%s706_s4 + $0x18] sm:$0xff] }
 0x19e   :  { %v308_v26 = vpop.xlane.xlu0 %307 }
 0x19f   :  { %v324_v27 = vadd.f32 %v308_v26, %v300_v25 }
 0x1a1   :  { %329 = vst.msk [vmem:[%s705_s3] sm:$0xff] %vm47_vm2, %v324_v27 }
 0x1a2   :  { %v357_v29 = vpop.xlane.xlu0 %356 }
 0x1a3   :  { %v373_v31 = vadd.f32 %v357_v29, %v333_v28  ;;  %v362_v32 = vpop.xlane.xlu1 %361 }
 0x1a4   :  { %v374_v34 = vadd.f32 %v362_v32, %v334_v30 }
 0x1a5   :  { %377 = vst.msk [vmem:[%s706_s4] sm:$0xff] %vm47_vm2, %v373_v31 }
 0x1a6   :  { %v313_v35 = vpop.xlane.xlu0 %312  ;;  %378 = vst.msk [vmem:[%s706_s4 + $0x8] sm:$0xff] %vm47_vm2, %v374_v34 }
 0x1a7   :  { %v325_v37 = vadd.f32 %v313_v35, %v301_v33  ;;  %v318_v38 = vpop.xlane.xlu1 %317 }
 0x1a8   :  { %v326_v40 = vadd.f32 %v318_v38, %v302_v36 }
 0x1a9   :  { %330 = vst.msk [vmem:[%s705_s3 + $0x8] sm:$0xff] %vm47_vm2, %v325_v37 }
 0x1aa   :  { %v367_v41 = vpop.xlane.xlu0 %366  ;;  %331 = vst.msk [vmem:[%s705_s3 + $0x10] sm:$0xff] %vm47_vm2, %v326_v40 }
 0x1ab   :  { %v375_v43 = vadd.f32 %v367_v41, %v335_v39  ;;  %v323_v44 = vpop.xlane.xlu1 %322 }
 0x1ac   :  { %v327_v45 = vadd.f32 %v323_v44, %v303_v42 }
 0x1ad   :  { %379 = vst.msk [vmem:[%s706_s4 + $0x10] sm:$0xff] %vm47_vm2, %v375_v43 }
 0x1ae   :  { %332 = vst.msk [vmem:[%s705_s3 + $0x18] sm:$0xff] %vm47_vm2, %v327_v45 }
 0x1af   :  { %v372_v47 = vpop.xlane.xlu1 %371 }
 0x1b0   :  { %v376_v48 = vadd.f32 %v372_v47, %v336_v46 }
 0x1b2   :  { %380 = vst.msk [vmem:[%s706_s4 + $0x18] sm:$0xff] %vm47_vm2, %v376_v48 }
 0x1b3   :  { %513 = dma.done.wait [#allocation4], 2048  }
 0x1b4   :  { %514 = vsyncadd [#allocation4], 4294965248 }
 0x1b5   :  { %404 = vsyncpa [#allocation3], 1 }
 0x1b6   :  { %405 = vsyncpa [#allocation6], 1 }
 0x1b7   :  { %406 = vsyncpa [#allocation4], 1 }

</bundles_post_ra>
